<compile_context>
chip_gen: v5e
topology: v5e:2x2
jax: 0.10.0
libtpu: 0.0.40
codegen_flags: <defaults>
</compile_context>

<pallas_src>
import jax
import jax.numpy as jnp
from jax.experimental import pallas as pl
from jax.experimental.pallas import tpu as pltpu

_BN_EPS = 1e-5


# ---------------------------------------------------------------------------
# Pallas kernel: fused conv-as-GEMM + folded-BN bias + ReLU
# ---------------------------------------------------------------------------
def _initial_block_kernel(x_ref, w_ref, b_ref, o_ref):
    """o[0] = relu( w @ x[0] + b )  with f32 accumulation.

    x_ref : (1, K, TN)    space-to-depth patches (K = 2*2*Cin), TN spatial lanes
    w_ref : (Cout, K)     BN-scale-folded weights
    b_ref : (Cout, 1)     folded BN bias (f32)
    o_ref : (1, Cout, TN) output block (channel-major == NCHW layout)
    """
    y = jnp.dot(w_ref[...], x_ref[0], preferred_element_type=jnp.float32)
    y = y + b_ref[...]                                   # lane-broadcast bias
    o_ref[0] = jnp.maximum(y, 0.0).astype(o_ref.dtype)


def _round_up(v, m):
    return (v + m - 1) // m * m


def _pick_tn(msp, n_batch, max_tn=8192):
    """Spatial (lane) tile.

    - Use the full spatial extent when it fits (single wide block), else the
      largest 128-multiple tile (masked last block via pl.cdiv).  Never falls
      back to a tiny exact divisor.
    - If the resulting grid would have a single step (batch == 1, one tile),
      split the spatial axis so v7x's second TensorCore gets work.
    """
    tn = msp if msp <= max_tn else max_tn
    if n_batch * ((msp + tn - 1) // tn) < 2 and msp >= 256:
        tn = _round_up((msp + 1) // 2, 128)
    return tn


def _initial_block_matmul(xp, w_fold, bias, out_dtype, *, max_tn=8192):
    n, k, msp = xp.shape
    cout = w_fold.shape[0]
    tn = _pick_tn(msp, n, max_tn)
    grid = (n, pl.cdiv(msp, tn))

    bytes_accessed = (xp.size * xp.dtype.itemsize
                      + w_fold.size * w_fold.dtype.itemsize
                      + bias.size * bias.dtype.itemsize
                      + n * cout * msp * jnp.dtype(out_dtype).itemsize)
    cost = pl.CostEstimate(flops=2 * n * cout * k * msp,
                           transcendentals=0,
                           bytes_accessed=bytes_accessed)

    return pl.pallas_call(
        _initial_block_kernel,
        out_shape=jax.ShapeDtypeStruct((n, cout, msp), out_dtype),
        grid=grid,
        in_specs=[
            pl.BlockSpec((1, k, tn), lambda b, m: (b, 0, m)),
            pl.BlockSpec((cout, k), lambda b, m: (0, 0)),
            pl.BlockSpec((cout, 1), lambda b, m: (0, 0)),
        ],
        out_specs=pl.BlockSpec((1, cout, tn), lambda b, m: (b, 0, m)),
        compiler_params=pltpu.CompilerParams(
            dimension_semantics=("parallel", "parallel")),
        cost_estimate=cost,
    )(xp, w_fold, bias)


# ---------------------------------------------------------------------------
# Wrapper: BN folding + single-fused-producer space-to-depth (NCHW in/out)
# ---------------------------------------------------------------------------
def initial_block_forward(x_nchw, params, *, use_bf16=False,
                          out_dtype=jnp.float32, max_tn=8192):
    w = params["w"]                                  # (Cout, Cin, 2, 2)
    gamma, beta, mean, var = params["bn"]

    n, cin, h, wd = x_nchw.shape
    cout, _, kh, kw = w.shape
    assert (kh, kw) == (2, 2), "space-to-depth path assumes kernel_size=2"
    assert h % 2 == 0 and wd % 2 == 0, "H, W must be even (stride 2, pad 0)"
    hs, ws = h // 2, wd // 2
    msp = hs * ws
    k = cin * 4

    # Fold eval-mode BatchNorm into a per-output-channel weight scale + bias.
    scale = gamma * jax.lax.rsqrt(var.astype(jnp.float32) + _BN_EPS)   # (Cout,)
    cdtype = jnp.bfloat16 if use_bf16 else jnp.float32
    w_fold = (w.astype(jnp.float32) * scale[:, None, None, None]
              ).reshape(cout, k).astype(cdtype)
    bias = (beta - mean * scale).reshape(cout, 1).astype(jnp.float32)

    # Space-to-depth as a SINGLE fused producer (cast + transpose), emitted
    # directly in the compute dtype.  K ordering is (c, kh, kw) and matches
    # w.reshape(cout, cin*4) above.
    x6 = x_nchw.astype(cdtype).reshape(n, cin, hs, 2, ws, 2)

    # Small images: fold batch into the lane (spatial) axis so the output
    # block stays lane-dense (>=128 lanes); otherwise keep batch as a grid
    # axis and the kernel output is NCHW with zero post-transpose.
    fold_batch = (msp < 128) and (n > 1)
    if fold_batch:
        xp = x6.transpose(1, 3, 5, 0, 2, 4).reshape(1, k, n * msp)
    else:
        xp = x6.transpose(0, 1, 3, 5, 2, 4).reshape(n, k, msp)

    out = _initial_block_matmul(xp, w_fold, bias, out_dtype, max_tn=max_tn)

    if fold_batch:                                   # tiny case only
        out = out.reshape(cout, n, hs, ws).transpose(1, 0, 2, 3)
    else:
        out = out.reshape(n, cout, hs, ws)           # NCHW, no transpose
    return out


# ---------------------------------------------------------------------------
# Pure-JAX reference (for correctness check)
# ---------------------------------------------------------------------------
def reference_forward(x_nchw, params):
    w = params["w"]
    gamma, beta, mean, var = params["bn"]
    y = jax.lax.conv_general_dilated(
        x_nchw.astype(jnp.float32), w, (2, 2), [(0, 0), (0, 0)],
        dimension_numbers=("NCHW", "OIHW", "NCHW"))
    s = gamma * jax.lax.rsqrt(var + _BN_EPS)
    y = y * s[None, :, None, None] + (beta - mean * s)[None, :, None, None]
    return jnp.maximum(y, 0.0)


def init_params(key, in_channels, out_channels, kernel_size=2):
    w = 0.1 * jax.random.normal(
        key, (out_channels, in_channels, kernel_size, kernel_size), jnp.float32)
    r = jnp.arange(out_channels, dtype=jnp.float32)
    gamma = 1.0 + 0.10 * r
    beta = 0.01 * r - 0.05
    mean = 0.02 * (r - 3.0)
    var = 1.0 + 0.03 * r
    return {"w": w, "bn": (gamma, beta, mean, var)}


# ---------------------------------------------------------------------------
if __name__ == "__main__":
    in_channels, out_channels = 4, 16

    key = jax.random.PRNGKey(0)
    kx, kp, kx2 = jax.random.split(key, 3)
    x = jax.random.normal(kx, (2, in_channels, 16, 16), jnp.float32)   # NCHW
    params = init_params(kp, in_channels, out_channels)

    # Path 1: small image -> batch folded into the lane dim (lane-dense output)
    out = jax.block_until_ready(initial_block_forward(x, params))
    ref = jax.block_until_ready(reference_forward(x, params))
    assert out.shape == (2, out_channels, 8, 8), out.shape
    err = float(jnp.max(jnp.abs(out - ref)))
    assert err < 1e-4, err

    # Path 2: batch=1, larger spatial -> normal path with forced >=2 spatial
    # tiles (v7x megacore gets two grid steps).
    x2 = jax.random.normal(kx2, (1, in_channels, 32, 32), jnp.float32)
    out2 = jax.block_until_ready(initial_block_forward(x2, params))
    ref2 = jax.block_until_ready(reference_forward(x2, params))
    assert out2.shape == (1, out_channels, 16, 16), out2.shape
    err2 = float(jnp.max(jnp.abs(out2 - ref2)))
    assert err2 < 1e-4, err2

    # bf16-operand path: s2d producer emits bf16 directly (no f32 intermediate),
    # f32 accumulate + epilogue; loose check vs the f32 reference.
    out_bf16 = jax.block_until_ready(
        initial_block_forward(x, params, use_bf16=True))
    err_bf16 = float(jnp.max(jnp.abs(out_bf16 - ref)))
    assert err_bf16 < 1e-1, err_bf16

    print("KERNEL_OK")
</pallas_src>

<mosaic_0001>
module attributes {stable_mosaic.version = 11 : i64} {
  func.func @_initial_block_kernel(%arg0: i32, %arg1: i32, %arg2: memref<1x16x128xf32, #tpu.memory_space<vmem>>, %arg3: memref<16x16xf32, #tpu.memory_space<vmem>>, %arg4: memref<16x1xf32, #tpu.memory_space<vmem>>, %arg5: memref<1x16x128xf32, #tpu.memory_space<vmem>>) attributes {dimension_semantics = [#tpu.dimension_semantics<parallel>, #tpu.dimension_semantics<parallel>], iteration_bounds = array<i64: 1, 1>, scalar_prefetch = 0 : i64, scratch_operands = 0 : i64, tpu.core_type = #tpu.core_type<tc>, window_params = [{transform_indices = @transform_0, window_bounds = array<i64: 1, 16, 128>}, {pipeline_mode = #tpu.pipeline_mode<synchronous>, transform_indices = @transform_1, window_bounds = array<i64: 16, 16>}, {pipeline_mode = #tpu.pipeline_mode<synchronous>, transform_indices = @transform_2, window_bounds = array<i64: 16, 1>}, {transform_indices = @transform_3, window_bounds = array<i64: 1, 16, 128>}]} {
    %c0 = arith.constant 0 : index
    %c0_0 = arith.constant 0 : index
    %0 = vector.load %arg3[%c0, %c0_0] : memref<16x16xf32, #tpu.memory_space<vmem>>, vector<16x16xf32>
    %c0_1 = arith.constant 0 : index
    %c0_2 = arith.constant 0 : index
    %c0_3 = arith.constant 0 : index
    %1 = vector.load %arg2[%c0_1, %c0_2, %c0_3] : memref<1x16x128xf32, #tpu.memory_space<vmem>>, vector<1x16x128xf32>
    %2 = vector.shape_cast %1 : vector<1x16x128xf32> to vector<16x128xf32>
    %cst = arith.constant dense<0.000000e+00> : vector<16x128xf32>
    %3 = tpu.matmul %0, %2, %cst {dimension_numbers = #tpu.dot_dimension_numbers<[1], [0], [0], [1], [0, 0, 1, 1], [], []>} : vector<16x16xf32>, vector<16x128xf32>, vector<16x128xf32> -> vector<16x128xf32>
    %c0_4 = arith.constant 0 : index
    %c0_5 = arith.constant 0 : index
    %4 = vector.load %arg4[%c0_4, %c0_5] : memref<16x1xf32, #tpu.memory_space<vmem>>, vector<16x1xf32>
    %5 = vector.broadcast %4 : vector<16x1xf32> to vector<16x128xf32>
    %6 = arith.addf %3, %5 : vector<16x128xf32>
    %cst_6 = arith.constant 0.000000e+00 : f32
    %7 = vector.broadcast %cst_6 : f32 to vector<16x128xf32>
    %8 = arith.maximumf %6, %7 : vector<16x128xf32>
    %c0_7 = arith.constant 0 : index
    %c0_8 = arith.constant 0 : index
    %c0_9 = arith.constant 0 : index
    %9 = vector.load %arg5[%c0_7, %c0_8, %c0_9] : memref<1x16x128xf32, #tpu.memory_space<vmem>>, vector<1x16x128xf32>
    %10 = vector.shape_cast %9 : vector<1x16x128xf32> to vector<16x128xf32>
    %11 = vector.shape_cast %8 : vector<16x128xf32> to vector<1x16x128xf32>
    tpu.vector_store %arg5[%c0_7, %c0_8, %c0_9], %11 {strides = array<i32>} : memref<1x16x128xf32, #tpu.memory_space<vmem>>, vector<1x16x128xf32>,
    return
  }
  func.func @transform_0(%arg0: i32, %arg1: i32) -> (i32, i32, i32) {
    %c0_i32 = arith.constant 0 : i32
    %c0_i32_0 = arith.constant 0 : i32
    return %arg0, %c0_i32, %arg1 : i32, i32, i32
  }
  func.func @transform_1(%arg0: i32, %arg1: i32) -> (i32, i32) {
    %c0_i32 = arith.constant 0 : i32
    %c0_i32_0 = arith.constant 0 : i32
    %c0_i32_1 = arith.constant 0 : i32
    return %c0_i32, %c0_i32_0 : i32, i32
  }
  func.func @transform_2(%arg0: i32, %arg1: i32) -> (i32, i32) {
    %c0_i32 = arith.constant 0 : i32
    %c0_i32_0 = arith.constant 0 : i32
    %c0_i32_1 = arith.constant 0 : i32
    return %c0_i32, %c0_i32_0 : i32, i32
  }
  func.func @transform_3(%arg0: i32, %arg1: i32) -> (i32, i32, i32) {
    %c0_i32 = arith.constant 0 : i32
    %c0_i32_0 = arith.constant 0 : i32
    return %arg0, %c0_i32, %arg1 : i32, i32, i32
  }
}

</mosaic_0001>

<bundles_post_ra>
// kernel: tpu_custom_call.1
= control target key start
LH: loop header
LB: loop body
LE: loop exit
PB: predicated region body
PF: predicated region fallthrough
CT: control target
= control target key end

     0   :  { %8 = vsyncpa [#allocation3], 0  ;;  %s211_s0 = inlined_call_operand.vmem [shape: f32[1,16,128], index: 0, kind: input, shape index: {}]   ;;  %s212_s1 = inlined_call_operand.hbm [shape: f32[16,16], index: 1, kind: input, shape index: {}]   ;;  %s213_s2 = inlined_call_operand.vmem [shape: f32[16,1], index: 2, kind: input, shape index: {}]   ;;  %s214_s3 = inlined_call_operand.hbm [shape: f32[1,16,128], index: 3, kind: output, shape index: {}]  }
   0x1   :  { %9 = vsyncpa [#allocation4], 0  ;;  %s16_s14 = sshll.u32 %s212_s1, 4  ;;  %s162_s15 = smov [#allocation2]   ;;  %s17_s14 = int_to_ptr.hbm [resolvable:$true] %s16_s14 }
   0x2   :  { %s18_s16 = sshll.u32 %s162_s15, 4  ;;  %s163_s17 = smov 128   ;;  %s19_s16 = int_to_ptr.vmem [resolvable:$true] %s18_s16 }
   0x3   :  { %s164_s18 = smov 8  }
   0x4   :  { %24 = dma.hbm_to_vmem [thread:$0]  %s17_s14, 256, %s19_s16, [#allocation3], %s163_s17, %s163_s17, %s164_s18  }
   0x5   :  { %158 = dma.done.wait [#allocation3], 256  }
   0x6   :  { %159 = vsyncadd [#allocation3], 4294967040  ;;  %v165_v0 = vmov 0   ;;  %v35_v1 = vld [vmem:[%s213_s2] sm:$0xff]  ;;  %v34_v2 = vld [vmem:[%s211_s0 + $0x8] sm:$0xff]  ;;  %vm47_vm0 = vcmask 130048  }
   0x7   :  { %109 = vset.pattern.permute.xlu0 %v165_v0  ;;  %v33_v3 = vld [vmem:[%s211_s0] sm:$0xff]  ;;  %68 = vmatpush.msra.mxu0 %v34_v2  ;;  %v32_v5 = vld [vmem:[#allocation2 + $0x8] sm:$0xff]  ;;  %s166_s0 = smov [#allocation5]   ;;  %s87_s29 = sshll.u32 %s214_s3, 4  ;;  %s88_s29 = int_to_ptr.hbm [resolvable:$true] %s87_s29 }
   0x8   :  { %39 = vperm.xlu0 %109, %v35_v1   ;;  %v31_v4 = vld [vmem:[#allocation2] sm:$0xff]  ;;  %102 = vmatpush.msra.mxu1 %v34_v2  ;;  %v36_v6 = vld [vmem:[%s213_s2 + $0x8] sm:$0xff]  ;;  %s85_s26 = sshll.u32 %s166_s0, 4  ;;  %s86_s26 = int_to_ptr.vmem [resolvable:$true] %s85_s26 }
   0x9   :  { %69 = vmatpush.msra.mxu0 %v33_v3 }
   0xa   :  { %103 = vmatpush.msra.mxu1 %v33_v3  ;;  %100 = vmatmul.msk.f32.vlgmr.msra.gmra.mxu0 %vm47_vm0, %v31_v4 }
   0xb   :  { %101 = vmatmul.msk.f32.vlgmr.msra.gmra.mxu1 %vm47_vm0, %v32_v5 }
  0x10   :  { %44 = vperm.xlu0 %109, %v36_v6  }
  0x7a   :  { %v40_v7 = vpop.permute.xlu0 %39 }
  0x82   :  { %v45_v9 = vpop.permute.xlu0 %44 }
  0x87   :  { %v71_v8 = vpop.f32.mrf.mxu0 }
  0x88   :  { %v72_v10 = vadd.f32 %v71_v8, %v40_v7  ;;  %v74_v11 = vpop.f32.mrf.mxu1 }
  0x89   :  { %v75_v12 = vadd.f32 %v74_v11, %v45_v9 }
  0x8a   :  { %v77_v13 = vmax.f32 %v72_v10, 0.0 }
  0x8b   :  { %v78_v14 = vmax.f32 %v75_v12, 0.0 }
  0x8c   :  { %79 = vst [vmem:[#allocation5] sm:$0xff] %v77_v13 }
  0x8d   :  { %80 = vst [vmem:[#allocation5 + $0x8] sm:$0xff] %v78_v14 }
  0x8e   :  { %93 = dma.vmem_to_hbm [thread:$0]  %s86_s26, 256, %s88_s29, [#allocation4], %s163_s17, %s163_s17, %s164_s18  }
  0x8f   :  { %160 = dma.done.wait [#allocation4], 256  }
  0x90   :  { %161 = vsyncadd [#allocation4], 4294967040 }
  0x91   :  { %98 = vsyncpa [#allocation3], 1 }
  0x92   :  { %99 = vsyncpa [#allocation4], 1 }

</bundles_post_ra>
